<compile_context>
chip_gen: v7x
topology: tpu7x:2x2x1
jax: 0.10.0
libtpu: 0.0.40
codegen_flags: <defaults>
</compile_context>

<pallas_src>
import functools

import jax
import jax.numpy as jnp
from jax.experimental import pallas as pl
from jax.experimental.pallas import tpu as pltpu


def _gcn3_kernel(adj_ref, x_ref, wf_ref, bf_ref, w2_ref, b2_ref, out_ref,
                 acc_ref, *, compute_dtype, rem_k, block_k):
    """One (row-tile, K-tile) grid step.

    acc_ref accumulates (A_tile @ X) in f32 across the K axis; the fused
    epilogue (folded gc+fc1, ReLU, fc2, log_softmax) runs at the last K step.
    """
    k = pl.program_id(1)
    nk = pl.num_programs(1)

    @pl.when(k == 0)
    def _():
        acc_ref[...] = jnp.zeros_like(acc_ref)

    a = adj_ref[...]
    if rem_k:
        # Statically-known ragged tail on the contraction axis: zero the
        # out-of-bounds adjacency columns of the last K block (the matching
        # x rows are zero-padded in the wrapper, so no garbage reaches the dot).
        col = jax.lax.broadcasted_iota(jnp.int32, a.shape, 1)
        limit = jnp.where(k == nk - 1, rem_k, block_k)
        a = jnp.where(col < limit, a, jnp.zeros_like(a))
    # Cast the streamed tile to the MXU compute dtype in-kernel (no extra
    # wrapper HBM pass; a no-op if the caller already passes bf16 adj).
    a = a.astype(compute_dtype)

    # GraphConvolution contraction, reassociated: acc += A_tile @ X_tile.
    acc_ref[...] += jnp.dot(a, x_ref[...], preferred_element_type=jnp.float32)

    @pl.when(k == nk - 1)
    def _():
        ax = acc_ref[...].astype(compute_dtype)
        # Folded GraphConvolution + fc1_a, then ReLU.
        h = jnp.dot(ax, wf_ref[...],
                    preferred_element_type=jnp.float32) + bf_ref[...]
        h = jnp.maximum(h, 0.0)
        # fc2_a
        z = jnp.dot(h.astype(compute_dtype), w2_ref[...],
                    preferred_element_type=jnp.float32) + b2_ref[...]
        # log_softmax over dim=1 (classes), numerically stable.
        m = jnp.max(z, axis=1, keepdims=True)
        s = z - m
        lse = jnp.log(jnp.sum(jnp.exp(s), axis=1, keepdims=True))
        out_ref[...] = (s - lse).astype(out_ref.dtype)


def gcn3_forward(x, adj, wg, bg, w1, b1, w2, b2, *,
                 block_rows=256,
                 block_k=2048,
                 compute_dtype=jnp.bfloat16,
                 adj_buffer_count=2,
                 vmem_limit_bytes=None):
    """GCN3 forward. adj:(N,N) dense, x:(N,in), weights (in,out), biases (1,out).

    Tuning notes (per-chip):
      v6e: block_rows=512 is ~1.3x better at large N (128 MiB VMEM).
      v5e: block_rows=128 halves VMEM pressure; MXU is 128-wide anyway.
      v7x: try adj_buffer_count=3; keep the row axis "parallel" for megacore.
    block_rows must be a multiple of 8 and block_k a multiple of 128 whenever
    they are smaller than N (otherwise they are clamped to N).
    """
    n = adj.shape[0]
    in_dim = x.shape[1]
    ncls = w2.shape[1]

    # Fold the GraphConvolution weight into fc1 (no nonlinearity in between):
    #   ((A@X) @ Wg + bg) @ W1 + b1 == (A@X) @ (Wg@W1) + (bg@W1 + b1)
    wg32, bg32, w132, b132 = (t.astype(jnp.float32) for t in (wg, bg, w1, b1))
    w_fused = (wg32 @ w132).astype(compute_dtype)       # (in_dim, hid)
    b_fused = bg32 @ w132 + b132                         # (1, hid), f32
    x_c = x.astype(compute_dtype)
    w2_c = w2.astype(compute_dtype)
    b2_c = b2.astype(jnp.float32)
    # NOTE: adj is intentionally NOT cast or padded in the wrapper (it is the
    # dominant HBM stream); it is tiled and cast in-kernel.

    tm = min(block_rows, n)
    tk = min(block_k, n)
    grid = (pl.cdiv(n, tm), pl.cdiv(n, tk))
    rem_k = n % tk  # ragged tail on the contraction axis (0 => none)

    # Only x (N x in_dim, tiny) is zero-padded so its K blocks never read OOB.
    n_k_pad = grid[1] * tk
    if n_k_pad != n:
        x_c = jnp.pad(x_c, ((0, n_k_pad - n), (0, 0)))

    if vmem_limit_bytes is None:
        lane = 128
        est = (adj_buffer_count * tm * max(tk, lane) * adj.dtype.itemsize  # adj stream
               + 2 * tk * lane * x_c.dtype.itemsize                        # x stream
               + 2 * tm * lane * 4                                         # out (lane padded)
               + tm * lane * 4                                             # f32 accumulator
               + (1 << 20))                                                # weights + slack
        vmem_limit_bytes = min(100 << 20, max(2 * est, 32 << 20))

    adj_spec_kwargs = {}
    if adj_buffer_count != 2:   # default double-buffering needs no annotation
        adj_spec_kwargs["pipeline_mode"] = pl.Buffered(adj_buffer_count)
    adj_spec = pl.BlockSpec((tm, tk), lambda i, k: (i, k), **adj_spec_kwargs)

    def resident(arr):
        # Small constant-index operands (weights/biases), kept resident.
        return pl.BlockSpec(arr.shape, lambda i, k: (0, 0))

    kernel = functools.partial(_gcn3_kernel, compute_dtype=compute_dtype,
                               rem_k=rem_k, block_k=tk)

    return pl.pallas_call(
        kernel,
        out_shape=jax.ShapeDtypeStruct((n, ncls), jnp.float32),
        grid=grid,
        in_specs=[
            adj_spec,                                           # (TM, TK) stream
            pl.BlockSpec((tk, in_dim), lambda i, k: (k, 0)),    # (TK, in) stream
            resident(w_fused), resident(b_fused),
            resident(w2_c), resident(b2_c),
        ],
        out_specs=pl.BlockSpec((tm, ncls), lambda i, k: (i, 0)),
        scratch_shapes=[pltpu.VMEM((tm, in_dim), jnp.float32)],
        compiler_params=pltpu.CompilerParams(
            dimension_semantics=("parallel", "arbitrary"),
            vmem_limit_bytes=vmem_limit_bytes,
        ),
    )(adj, x_c, w_fused, b_fused, w2_c, b2_c)


def _uniform(key, shape, bound):
    return jax.random.uniform(key, shape, jnp.float32, -bound, bound)


if __name__ == "__main__":
    # Small shapes consistent with the module:
    #   N nodes = 8, in_dim = 16, out_dim = 32, fc1 -> 32, fc2 -> 2
    N, IN_DIM, OUT_DIM, HID, NCLS = 8, 16, 32, 32, 2

    key = jax.random.PRNGKey(0)
    keys = jax.random.split(key, 8)

    # Inputs
    x = jax.random.normal(keys[0], (N, IN_DIM), jnp.float32)
    adj_raw = jax.random.uniform(keys[1], (N, N), jnp.float32)
    adj = adj_raw / jnp.sum(adj_raw, axis=1, keepdims=True)  # row-normalized

    # GraphConvolution params: uniform(-1/sqrt(out_dim), 1/sqrt(out_dim))
    stdv_g = 1.0 / (OUT_DIM ** 0.5)
    wg = _uniform(keys[2], (IN_DIM, OUT_DIM), stdv_g)
    bg = _uniform(keys[3], (1, OUT_DIM), stdv_g)

    # fc1_a: Linear(out_dim, 32); stored transposed as (in, out)
    stdv_1 = 1.0 / (OUT_DIM ** 0.5)
    w1 = _uniform(keys[4], (OUT_DIM, HID), stdv_1)
    b1 = _uniform(keys[5], (1, HID), stdv_1)

    # fc2_a: Linear(32, 2); stored transposed as (in, out)
    stdv_2 = 1.0 / (HID ** 0.5)
    w2 = _uniform(keys[6], (HID, NCLS), stdv_2)
    b2 = _uniform(keys[7], (1, NCLS), stdv_2)

    out = gcn3_forward(x, adj, wg, bg, w1, b1, w2, b2)
    out = jax.block_until_ready(out)

    # Reference in plain JAX mirroring the kernel's math (folded Wg@W1,
    # bf16 operands, f32 accumulation).
    bf, f32 = jnp.bfloat16, jnp.float32
    w_fused_r = (wg @ w1).astype(bf)
    b_fused_r = bg @ w1 + b1
    ax_r = jnp.dot(adj.astype(bf), x.astype(bf), preferred_element_type=f32)
    h_r = jnp.maximum(jnp.dot(ax_r.astype(bf), w_fused_r,
                              preferred_element_type=f32) + b_fused_r, 0.0)
    z_r = jnp.dot(h_r.astype(bf), w2.astype(bf),
                  preferred_element_type=f32) + b2
    ref = jax.nn.log_softmax(z_r, axis=1)

    assert out.shape == (N, NCLS)
    assert jnp.allclose(out, ref, atol=1e-4, rtol=1e-4), "mismatch vs reference"

    print("KERNEL_OK")
</pallas_src>

<mosaic_0001>
module attributes {stable_mosaic.version = 11 : i64} {
  func.func @_gcn3_kernel(%arg0: i32, %arg1: i32, %arg2: memref<8x8xf32, #tpu.memory_space<vmem>>, %arg3: memref<8x16xbf16, #tpu.memory_space<vmem>>, %arg4: memref<16x32xbf16, #tpu.memory_space<vmem>>, %arg5: memref<1x32xf32, #tpu.memory_space<vmem>>, %arg6: memref<32x2xbf16, #tpu.memory_space<vmem>>, %arg7: memref<1x2xf32, #tpu.memory_space<vmem>>, %arg8: memref<8x2xf32, #tpu.memory_space<vmem>>, %arg9: memref<8x16xf32, #tpu.memory_space<vmem>>) attributes {dimension_semantics = [#tpu.dimension_semantics<parallel>, #tpu.dimension_semantics<arbitrary>], iteration_bounds = array<i64: 1, 1>, scalar_prefetch = 0 : i64, scratch_operands = 1 : i64, tpu.core_type = #tpu.core_type<tc>, window_params = [{transform_indices = @transform_0, window_bounds = array<i64: 8, 8>}, {transform_indices = @transform_1, window_bounds = array<i64: 8, 16>}, {pipeline_mode = #tpu.pipeline_mode<synchronous>, transform_indices = @transform_2, window_bounds = array<i64: 16, 32>}, {pipeline_mode = #tpu.pipeline_mode<synchronous>, transform_indices = @transform_3, window_bounds = array<i64: 1, 32>}, {pipeline_mode = #tpu.pipeline_mode<synchronous>, transform_indices = @transform_4, window_bounds = array<i64: 32, 2>}, {pipeline_mode = #tpu.pipeline_mode<synchronous>, transform_indices = @transform_5, window_bounds = array<i64: 1, 2>}, {transform_indices = @transform_6, window_bounds = array<i64: 8, 2>}]} {
    %c0_i32 = arith.constant 0 : i32
    %0 = arith.cmpi eq, %arg1, %c0_i32 : i32
    %1 = arith.extui %0 : i1 to i32
    %c0_i32_0 = arith.constant 0 : i32
    %2 = arith.cmpi ne, %1, %c0_i32_0 : i32
    scf.if %2 {
      %cst_10 = arith.constant 0.000000e+00 : f32
      %13 = vector.broadcast %cst_10 : f32 to vector<8x16xf32>
      %c0_11 = arith.constant 0 : index
      %c0_12 = arith.constant 0 : index
      %14 = vector.load %arg9[%c0_11, %c0_12] : memref<8x16xf32, #tpu.memory_space<vmem>>, vector<8x16xf32>
      tpu.vector_store %arg9[%c0_11, %c0_12], %13 {strides = array<i32>} : memref<8x16xf32, #tpu.memory_space<vmem>>, vector<8x16xf32>,
    } else {
    }
    %c0 = arith.constant 0 : index
    %c0_1 = arith.constant 0 : index
    %3 = vector.load %arg2[%c0, %c0_1] : memref<8x8xf32, #tpu.memory_space<vmem>>, vector<8x8xf32>
    %4 = arith.truncf %3 : vector<8x8xf32> to vector<8x8xbf16>
    %c0_2 = arith.constant 0 : index
    %c0_3 = arith.constant 0 : index
    %5 = vector.load %arg9[%c0_2, %c0_3] : memref<8x16xf32, #tpu.memory_space<vmem>>, vector<8x16xf32>
    %c0_4 = arith.constant 0 : index
    %c0_5 = arith.constant 0 : index
    %6 = vector.load %arg3[%c0_4, %c0_5] : memref<8x16xbf16, #tpu.memory_space<vmem>>, vector<8x16xbf16>
    %cst = arith.constant dense<0.000000e+00> : vector<8x16xf32>
    %7 = tpu.matmul %4, %6, %cst {dimension_numbers = #tpu.dot_dimension_numbers<[1], [0], [0], [1], [0, 0, 1, 1], [], []>} : vector<8x8xbf16>, vector<8x16xbf16>, vector<8x16xf32> -> vector<8x16xf32>
    %8 = arith.addf %5, %7 : vector<8x16xf32>
    %c0_6 = arith.constant 0 : index
    %c0_7 = arith.constant 0 : index
    %9 = vector.load %arg9[%c0_6, %c0_7] : memref<8x16xf32, #tpu.memory_space<vmem>>, vector<8x16xf32>
    tpu.vector_store %arg9[%c0_6, %c0_7], %8 {strides = array<i32>} : memref<8x16xf32, #tpu.memory_space<vmem>>, vector<8x16xf32>,
    %c0_i32_8 = arith.constant 0 : i32
    %10 = arith.cmpi eq, %arg1, %c0_i32_8 : i32
    %11 = arith.extui %10 : i1 to i32
    %c0_i32_9 = arith.constant 0 : i32
    %12 = arith.cmpi ne, %11, %c0_i32_9 : i32
    scf.if %12 {
      %c0_10 = arith.constant 0 : index
      %c0_11 = arith.constant 0 : index
      %13 = vector.load %arg9[%c0_10, %c0_11] : memref<8x16xf32, #tpu.memory_space<vmem>>, vector<8x16xf32>
      %14 = arith.truncf %13 : vector<8x16xf32> to vector<8x16xbf16>
      %c0_12 = arith.constant 0 : index
      %c0_13 = arith.constant 0 : index
      %15 = vector.load %arg4[%c0_12, %c0_13] : memref<16x32xbf16, #tpu.memory_space<vmem>>, vector<16x32xbf16>
      %cst_14 = arith.constant dense<0.000000e+00> : vector<8x32xf32>
      %16 = tpu.matmul %14, %15, %cst_14 {dimension_numbers = #tpu.dot_dimension_numbers<[1], [0], [0], [1], [0, 0, 1, 1], [], []>} : vector<8x16xbf16>, vector<16x32xbf16>, vector<8x32xf32> -> vector<8x32xf32>
      %c0_15 = arith.constant 0 : index
      %c0_16 = arith.constant 0 : index
      %17 = vector.load %arg5[%c0_15, %c0_16] : memref<1x32xf32, #tpu.memory_space<vmem>>, vector<1x32xf32>
      %18 = vector.broadcast %17 : vector<1x32xf32> to vector<8x32xf32>
      %19 = arith.addf %16, %18 : vector<8x32xf32>
      %cst_17 = arith.constant 0.000000e+00 : f32
      %20 = vector.broadcast %cst_17 : f32 to vector<8x32xf32>
      %21 = arith.maximumf %19, %20 : vector<8x32xf32>
      %22 = arith.truncf %21 : vector<8x32xf32> to vector<8x32xbf16>
      %c0_18 = arith.constant 0 : index
      %c0_19 = arith.constant 0 : index
      %23 = vector.load %arg6[%c0_18, %c0_19] : memref<32x2xbf16, #tpu.memory_space<vmem>>, vector<32x2xbf16>
      %cst_20 = arith.constant dense<0.000000e+00> : vector<8x2xf32>
      %24 = tpu.matmul %22, %23, %cst_20 {dimension_numbers = #tpu.dot_dimension_numbers<[1], [0], [0], [1], [0, 0, 1, 1], [], []>} : vector<8x32xbf16>, vector<32x2xbf16>, vector<8x2xf32> -> vector<8x2xf32>
      %c0_21 = arith.constant 0 : index
      %c0_22 = arith.constant 0 : index
      %25 = vector.load %arg7[%c0_21, %c0_22] : memref<1x2xf32, #tpu.memory_space<vmem>>, vector<1x2xf32>
      %26 = vector.broadcast %25 : vector<1x2xf32> to vector<8x2xf32>
      %27 = arith.addf %24, %26 : vector<8x2xf32>
      %cst_23 = arith.constant dense<0xFF800000> : vector<8xf32>
      %28 = vector.multi_reduction <maximumf>, %27, %cst_23 [1] : vector<8x2xf32> to vector<8xf32>
      %29 = vector.shape_cast %28 : vector<8xf32> to vector<8x1xf32>
      %30 = vector.broadcast %29 : vector<8x1xf32> to vector<8x2xf32>
      %31 = arith.subf %27, %30 : vector<8x2xf32>
      %32 = math.exp %31 : vector<8x2xf32>
      %cst_24 = arith.constant dense<0.000000e+00> : vector<8xf32>
      %33 = vector.multi_reduction <add>, %32, %cst_24 [1] : vector<8x2xf32> to vector<8xf32>
      %34 = vector.shape_cast %33 : vector<8xf32> to vector<8x1xf32>
      %35 = math.log %34 : vector<8x1xf32>
      %36 = vector.broadcast %35 : vector<8x1xf32> to vector<8x2xf32>
      %37 = arith.subf %31, %36 : vector<8x2xf32>
      %c0_25 = arith.constant 0 : index
      %c0_26 = arith.constant 0 : index
      %38 = vector.load %arg8[%c0_25, %c0_26] : memref<8x2xf32, #tpu.memory_space<vmem>>, vector<8x2xf32>
      tpu.vector_store %arg8[%c0_25, %c0_26], %37 {strides = array<i32>} : memref<8x2xf32, #tpu.memory_space<vmem>>, vector<8x2xf32>,
    } else {
    }
    return
  }
  func.func @transform_0(%arg0: i32, %arg1: i32) -> (i32, i32) {
    %c0_i32 = arith.constant 0 : i32
    return %arg0, %arg1 : i32, i32
  }
  func.func @transform_1(%arg0: i32, %arg1: i32) -> (i32, i32) {
    %c0_i32 = arith.constant 0 : i32
    %c0_i32_0 = arith.constant 0 : i32
    return %arg1, %c0_i32 : i32, i32
  }
  func.func @transform_2(%arg0: i32, %arg1: i32) -> (i32, i32) {
    %c0_i32 = arith.constant 0 : i32
    %c0_i32_0 = arith.constant 0 : i32
    %c0_i32_1 = arith.constant 0 : i32
    return %c0_i32, %c0_i32_0 : i32, i32
  }
  func.func @transform_3(%arg0: i32, %arg1: i32) -> (i32, i32) {
    %c0_i32 = arith.constant 0 : i32
    %c0_i32_0 = arith.constant 0 : i32
    %c0_i32_1 = arith.constant 0 : i32
    return %c0_i32, %c0_i32_0 : i32, i32
  }
  func.func @transform_4(%arg0: i32, %arg1: i32) -> (i32, i32) {
    %c0_i32 = arith.constant 0 : i32
    %c0_i32_0 = arith.constant 0 : i32
    %c0_i32_1 = arith.constant 0 : i32
    return %c0_i32, %c0_i32_0 : i32, i32
  }
  func.func @transform_5(%arg0: i32, %arg1: i32) -> (i32, i32) {
    %c0_i32 = arith.constant 0 : i32
    %c0_i32_0 = arith.constant 0 : i32
    %c0_i32_1 = arith.constant 0 : i32
    return %c0_i32, %c0_i32_0 : i32, i32
  }
  func.func @transform_6(%arg0: i32, %arg1: i32) -> (i32, i32) {
    %c0_i32 = arith.constant 0 : i32
    %c0_i32_0 = arith.constant 0 : i32
    return %arg0, %c0_i32 : i32, i32
  }
}

</mosaic_0001>

<bundles_post_ra>
// kernel: tpu_custom_call.1
= control target key start
LH: loop header
LB: loop body
LE: loop exit
PB: predicated region body
PF: predicated region fallthrough
CT: control target
= control target key end

     0   :  { %vm38_vm0 = vcmask 1043456   ;;  %v279_v0 = vmov 0.0   ;;  %vm280_vm1 = vmmov 0   ;;  %vm28_vm2 = vcmask 130048   ;;  %s346_s1 = inlined_call_operand.vmem [shape: bf16[8,16], index: 1, kind: input, shape index: {}]   ;;  %s347_s0 = inlined_call_operand.vmem [shape: f32[8,8], index: 0, kind: input, shape index: {}]   ;;  %s348_s2 = inlined_call_operand.vmem [shape: bf16[16,32], index: 2, kind: input, shape index: {}]   ;;  %s349_s4 = inlined_call_operand.vmem [shape: bf16[32,2], index: 4, kind: input, shape index: {}]   ;;  %s350_s3 = inlined_call_operand.vmem [shape: f32[1,32], index: 3, kind: input, shape index: {}]   ;;  %s351_s5 = inlined_call_operand.vmem [shape: f32[1,2], index: 5, kind: input, shape index: {}]   ;;  %s352_s6 = inlined_call_operand.vmem [shape: f32[8,2], index: 6, kind: output, shape index: {}]  }
   0x1   :  { %250 = vmatprep.subr.bf16.mxu0 %v279_v0  ;;  %v33_v1 = vld [vmem:[%s346_s1] sm:$0xf]  ;;  %252 = vmatprep.mubr.msk.bf16.mxu0 %vm280_vm1, %v279_v0  ;;  %29 = vst.msk [vmem:[#allocation2] sm:$0xff] %vm28_vm2, %v279_v0  ;;  %vm34_vm3 = vcmask 64512   ;;  %v274_v15 = vld [vmem:[%s349_s4 + $0x8] sm:$0xff]   ;;  %vm173_vm4 = vcmask 261120  }
   0x2   :  { %v30_v2 = vld [vmem:[%s347_s0] sm:$0xff]  ;;  %v40_v3 = vsel %vm38_vm0, %v33_v1, 0  ;;  %256 = vmatprep.subr.bf16.mxu1 %v279_v0  ;;  %258 = vmatprep.mubr.msk.bf16.mxu1 %vm280_vm1, %v279_v0  ;;  %vm217_vm5 = vcmask 15360  }
   0x3   :  { %v31_v4 = vpack.c.bf16 %v30_v2, %v30_v2  ;;  %251 = vmatpush3.bf16.msra.mxu0 %v40_v3  ;;  %v272_v5 = vld [vmem:[%s348_s2] sm:$0xff]  }
   0x4   :  { %262 = vmatprep.subr.bf16.mxu0 %v279_v0  ;;  %257 = vmatpush3.bf16.msra.mxu1 %v272_v5  ;;  %v273_v6 = vld [vmem:[%s349_s4] sm:$0xff]  }
   0x5   :  { %v236_v16 = vld [vmem:[%s350_s3] ss:$0 sm:$0xff] }
   0x6   :  { %253 = vmatmul.mubr.msk.bf16.vlgmr.msra.gmra.mrb[0].mxu0 %vm34_vm3, %v31_v4  ;;  %v239_v24 = vld [vmem:[%s351_s5] ss:$0 sm:$0xff] }
   0x7   :  { %266 = vmatprep.mubr.msk.bf16.mxu0 %vm280_vm1, %v279_v0  ;;  %263 = vmatpush3.bf16.msra.mxu0 %v273_v6 }
   0x8   :  { %264 = vmatprep.subr.bf16.mxu0 %v279_v0  ;;  %v32_v7 = vld [vmem:[#allocation2] sm:$0xff] }
   0xb   :  { %265 = vmatpush3.bf16.msra.mxu0 %v274_v15 }
  0xd9   :  { %v76_v8 = vpop.f32.mrb[0].mxu0 }
  0xda   :  { %v82_v9 = vadd.f32 %v76_v8, %v32_v7  ;;  %v254_v10 = vpop.f32.mrb[1].mxu0 }
  0xdb   :  { %v79_v11 = vpop.f32.mrb[2].mxu0 }
  0xdc   :  { %84 = vst.msk [vmem:[#allocation2] sm:$0xff] %vm28_vm2, %v82_v9  ;;  %v255_v12 = vpop.f32.mrb[3].mxu0 }
  0xe3   :  { %v88_v13 = vld [vmem:[#allocation2] sm:$0xff] }
  0xe4   :  { %v89_v14 = vpack.c.bf16 %v88_v13, %v88_v13 }
  0xe6   :  { %259 = vmatmul.mubr.msk.bf16.vlgmr.msra.gmra.mrb[0].mxu1 %vm28_vm2, %v89_v14 }
 0x1b9   :  { %v142_v17 = vpop.f32.mrb[0].mxu1 }
 0x1ba   :  { %v143_v18 = vadd.f32 %v236_v16, %v142_v17  ;;  %v260_v19 = vpop.f32.mrb[1].mxu1 }
 0x1bb   :  { %v145_v20 = vpop.f32.mrb[2].mxu1 }
 0x1bc   :  { %v148_v21 = vmax.f32 %v143_v18, 0.0  ;;  %v261_v22 = vpop.f32.mrb[3].mxu1 }
 0x1be   :  { %v149_v23 = vpack.c.bf16 %v148_v21, %v148_v21 }
 0x1c0   :  { %267 = vmatmul.mubr.msk.bf16.vlgmr.msra.gmra.mrb[4].mxu0 %vm173_vm4, %v149_v23 }
 0x293   :  { %v211_v25 = vpop.f32.mrb[4].mxu0 }
 0x294   :  { %v212_v26 = vadd.f32 %v239_v24, %v211_v25  ;;  %v268_v27 = vpop.f32.mrb[5].mxu0 }
 0x295   :  { %v214_v28 = vpop.f32.mrb[6].mxu0 }
 0x296   :  { %v269_v29 = vpop.f32.mrb[7].mxu0  ;;  %v218_v30 = vsel %vm217_vm5, %v212_v26, -inf }
 0x297   :  { %219 = vmax.xlane.f32.xlu0 %v218_v30 }
 0x324   :  { %v220_v31 = vpop.xlane.xlu0 %219 }
 0x325   :  { %v221_v32 = vsub.f32 %v212_v26, %v220_v31 }
 0x327   :  { %v222_v33 = vmul.f32 1.442695, %v221_v32 }
 0x329   :  { %275 = vpow2.f32 %v222_v33 }
 0x333   :  { %v276_v34 = vpop.eup %275 }
 0x334   :  { %v224_v35 = vsel %vm217_vm5, %v276_v34, 0.0 }
 0x335   :  { %225 = vadd.xlane.f32.xlu0 %v224_v35 }
 0x3c2   :  { %v226_v36 = vpop.xlane.xlu0 %225 }
 0x3c3   :  { %277 = vlog2.f32 %v226_v36 }
 0x3cd   :  { %v278_v37 = vpop.eup %277 }
 0x3ce   :  { %v228_v38 = vmul.f32 0.6931472, %v278_v37 }
 0x3d0   :  { %v229_v39 = vsub.f32 %v221_v32, %v228_v38 }
 0x3d2   :  { %230 = vst.msk [vmem:[%s352_s6] sm:$0xff] %vm217_vm5, %v229_v39 }

</bundles_post_ra>
